<compile_context>
chip_gen: v5e
topology: v5e:2x2
jax: 0.10.0
libtpu: 0.0.40
codegen_flags: <defaults>
</compile_context>

<pallas_src>
import functools

import jax
import jax.numpy as jnp
import numpy as np
from jax.experimental import pallas as pl
from jax.experimental.pallas import tpu as pltpu

NEG_SLOPE = 0.01  # nn.LeakyReLU(negative_slope=0.01)


def _leaky_relu(x):
    return jnp.where(x > 0, x, NEG_SLOPE * x)


def _conv_block_kernel(x_ref, w1_ref, b1_ref, w2_ref, b2_ref, o_ref,
                       xw_s, xim1_s, h_s, xim2_s, *, K, dil, pad):
    """One (batch, length-tile) step of the fused ConvBlock.

    x_ref  : (1, Cin, TL)       current length tile of the input (f32)
    w1_ref : (Dm, K*Cin)        conv1 weight, tap-major im2col layout (bf16)
    b1_ref : (Dm, 1)            conv1 bias (f32)
    w2_ref : (Cout, K*Dm)       conv2 weight, tap-major im2col layout (bf16)
    b2_ref : (Cout, 1)          conv2 bias (f32)
    o_ref  : (1, Cout, TL)
    xw_s   : (Cin, TL + 2*pad)  input window incl. causal halo (persists over i)
    xim1_s : (K*Cin, TL + pad)  conv1 im2col operand
    h_s    : (Dm, TL + pad)     conv1 activation incl. halo needed by conv2
    xim2_s : (K*Dm, TL)         conv2 im2col operand
    """
    i = pl.program_id(1)
    Cin, TL = x_ref.shape[1], x_ref.shape[2]
    Dm = w1_ref.shape[0]
    p2 = 2 * pad

    # ---- causal halo: first tile replicates x[:, 0] (replicate padding), ----
    # ---- later tiles reuse the tail of the previous tile's window (the   ----
    # ---- scratch persists across sequential grid steps along the L axis) ----
    @pl.when(i == 0)
    def _():
        xw_s[:, 0:p2] = jnp.broadcast_to(x_ref[0, :, 0:1], (Cin, p2))

    @pl.when(i > 0)
    def _():
        xw_s[:, 0:p2] = xw_s[:, TL:TL + p2]

    xw_s[:, p2:p2 + TL] = x_ref[0]

    # ---- conv1: single (Dm, K*Cin) @ (K*Cin, TL+pad) bf16 MXU matmul ----
    # (also computes the `pad` halo columns that conv2 needs on its left)
    for k in range(K):
        xim1_s[k * Cin:(k + 1) * Cin, :] = xw_s[:, k * dil:k * dil + TL + pad]
    h = jnp.dot(w1_ref[...], xim1_s[...].astype(jnp.bfloat16),
                preferred_element_type=jnp.float32)
    h_s[...] = _leaky_relu(h + b1_ref[...])

    # ---- conv2: single (Cout, K*Dm) @ (K*Dm, TL) bf16 MXU matmul ----
    for k in range(K):
        xim2_s[k * Dm:(k + 1) * Dm, :] = h_s[:, k * dil:k * dil + TL]
    y = jnp.dot(w2_ref[...], xim2_s[...].astype(jnp.bfloat16),
                preferred_element_type=jnp.float32)
    y = _leaky_relu(y + b2_ref[...])

    # TODO(synk): nn.Dropout(p=0.1) is identity in eval mode; training-mode
    # dropout (pltpu.prng_random_bits mask) is intentionally not applied.
    o_ref[0] = y.astype(o_ref.dtype)


def conv_block(x, w1, b1, w2, b2, *, kernel_size=3, dilation=1, l_tile=512):
    """Fused ConvBlock forward.

    x  : (B, Cin, L) f32 in PyTorch NCL layout.
    w1 : (Dm, Cin, K) PyTorch Conv1d weight,  b1 : (Dm,)
    w2 : (Cout, Dm, K) PyTorch Conv1d weight, b2 : (Cout,)
    Returns (B, Cout, L) f32.
    """
    B, Cin, L = x.shape
    Dm = w1.shape[0]
    Cout = w2.shape[0]
    K = kernel_size
    pad = (K - 1) * dilation

    # Length tile: whole (short) sequence, or a 128-aligned tile of it.
    if L <= l_tile:
        TL = L
    else:
        TL = l_tile
        assert l_tile % 128 == 0 and L % l_tile == 0, \
            "L must be a multiple of the 128-aligned length tile"
    NL = L // TL
    assert TL >= 2 * pad, "length tile must cover the causal halo"

    # Tap-major im2col weight layout: W[o, k*Cin + c] = w[o, c, k]; bf16 for MXU.
    w1_mat = jnp.transpose(w1, (0, 2, 1)).reshape(Dm, K * Cin).astype(jnp.bfloat16)
    w2_mat = jnp.transpose(w2, (0, 2, 1)).reshape(Cout, K * Dm).astype(jnp.bfloat16)
    b1c = b1.reshape(Dm, 1).astype(jnp.float32)
    b2c = b2.reshape(Cout, 1).astype(jnp.float32)

    kernel = functools.partial(_conv_block_kernel, K=K, dil=dilation, pad=pad)

    return pl.pallas_call(
        kernel,
        out_shape=jax.ShapeDtypeStruct((B, Cout, L), x.dtype),
        grid_spec=pltpu.PrefetchScalarGridSpec(
            num_scalar_prefetch=0,
            grid=(B, NL),
            in_specs=[
                pl.BlockSpec((1, Cin, TL), lambda b, i: (b, 0, i)),
                pl.BlockSpec((Dm, K * Cin), lambda b, i: (0, 0)),
                pl.BlockSpec((Dm, 1), lambda b, i: (0, 0)),
                pl.BlockSpec((Cout, K * Dm), lambda b, i: (0, 0)),
                pl.BlockSpec((Cout, 1), lambda b, i: (0, 0)),
            ],
            out_specs=pl.BlockSpec((1, Cout, TL), lambda b, i: (b, 0, i)),
            scratch_shapes=[
                pltpu.VMEM((Cin, TL + 2 * pad), jnp.float32),
                pltpu.VMEM((K * Cin, TL + pad), jnp.float32),
                pltpu.VMEM((Dm, TL + pad), jnp.float32),
                pltpu.VMEM((K * Dm, TL), jnp.float32),
            ]),
        compiler_params=pltpu.CompilerParams(
            # Batch tiles are independent (shard across v7x's 2 TensorCores);
            # the length axis carries the causal-halo scratch -> arbitrary.
            dimension_semantics=("parallel", "arbitrary")),
    )(x, w1_mat, b1c, w2_mat, b2c)


def _conv_block_ref(x, w1, b1, w2, b2, *, kernel_size=3, dilation=1):
    """Pure-JAX reference with the same bf16-operand / f32-accumulate precision."""
    K, dil = kernel_size, dilation
    p = (K - 1) * dil
    L = x.shape[2]
    q = lambda a: a.astype(jnp.bfloat16).astype(jnp.float32)
    xq, w1q, w2q = q(x), q(w1), q(w2)

    xp = jnp.concatenate([jnp.repeat(xq[:, :, :1], p, axis=2), xq], axis=2)
    h = b1[None, :, None]
    for k in range(K):
        h = h + jnp.einsum("dc,bcl->bdl", w1q[:, :, k],
                           xp[:, :, k * dil:k * dil + L])
    h = jnp.where(h > 0, h, NEG_SLOPE * h)

    hq = q(h)
    hp = jnp.concatenate([jnp.repeat(hq[:, :, :1], p, axis=2), hq], axis=2)
    y = b2[None, :, None]
    for k in range(K):
        y = y + jnp.einsum("cd,bdl->bcl", w2q[:, :, k],
                           hp[:, :, k * dil:k * dil + L])
    return jnp.where(y > 0, y, NEG_SLOPE * y)


def init_params(key, emb_len, d_model, kernel_size=3):
    """Deterministic PyTorch-style Conv1d init (uniform +-1/sqrt(fan_in*K))."""
    k1, k2, k3, k4 = jax.random.split(key, 4)
    bound1 = 1.0 / (emb_len * kernel_size) ** 0.5
    bound2 = 1.0 / (d_model * kernel_size) ** 0.5
    w1 = jax.random.uniform(k1, (d_model, emb_len, kernel_size), jnp.float32,
                            -bound1, bound1)
    b1 = jax.random.uniform(k2, (d_model,), jnp.float32, -bound1, bound1)
    w2 = jax.random.uniform(k3, (emb_len, d_model, kernel_size), jnp.float32,
                            -bound2, bound2)
    b2 = jax.random.uniform(k4, (emb_len,), jnp.float32, -bound2, bound2)
    return w1, b1, w2, b2


if __name__ == "__main__":
    key = jax.random.PRNGKey(0)
    kx1, kx2, kp = jax.random.split(key, 3)

    B, emb_len, d_model, K, dil = 2, 8, 32, 3, 1
    w1, b1, w2, b2 = init_params(kp, emb_len, d_model, K)

    # Case 1: PyTorch-sized toy input (B, emb_len, L) = (2, 8, 16), single tile.
    x_small = jax.random.normal(kx1, (B, emb_len, 16), jnp.float32)
    y_small = conv_block(x_small, w1, b1, w2, b2, kernel_size=K, dilation=dil)
    jax.block_until_ready(y_small)
    assert y_small.shape == (B, emb_len, 16)
    np.testing.assert_allclose(
        np.asarray(y_small),
        np.asarray(_conv_block_ref(x_small, w1, b1, w2, b2,
                                   kernel_size=K, dilation=dil)),
        atol=2e-2, rtol=2e-2)

    # Case 2: longer sequence exercising the multi-tile (length-tiled) path.
    x_long = jax.random.normal(kx2, (B, emb_len, 256), jnp.float32)
    y_long = conv_block(x_long, w1, b1, w2, b2, kernel_size=K, dilation=dil,
                        l_tile=128)
    jax.block_until_ready(y_long)
    assert y_long.shape == (B, emb_len, 256)
    np.testing.assert_allclose(
        np.asarray(y_long),
        np.asarray(_conv_block_ref(x_long, w1, b1, w2, b2,
                                   kernel_size=K, dilation=dil)),
        atol=2e-2, rtol=2e-2)

    print("KERNEL_OK")
</pallas_src>

<mosaic_0001>
module attributes {stable_mosaic.version = 11 : i64} {
  func.func @_conv_block_kernel(%arg0: i32, %arg1: i32, %arg2: memref<1x8x16xf32, #tpu.memory_space<vmem>>, %arg3: memref<32x24xbf16, #tpu.memory_space<vmem>>, %arg4: memref<32x1xf32, #tpu.memory_space<vmem>>, %arg5: memref<8x96xbf16, #tpu.memory_space<vmem>>, %arg6: memref<8x1xf32, #tpu.memory_space<vmem>>, %arg7: memref<1x8x16xf32, #tpu.memory_space<vmem>>, %arg8: memref<8x20xf32, #tpu.memory_space<vmem>>, %arg9: memref<24x18xf32, #tpu.memory_space<vmem>>, %arg10: memref<32x18xf32, #tpu.memory_space<vmem>>, %arg11: memref<96x16xf32, #tpu.memory_space<vmem>>) attributes {dimension_semantics = [#tpu.dimension_semantics<parallel>, #tpu.dimension_semantics<arbitrary>], iteration_bounds = array<i64: 2, 1>, scalar_prefetch = 0 : i64, scratch_operands = 4 : i64, tpu.core_type = #tpu.core_type<tc>, window_params = [{transform_indices = @transform_0, window_bounds = array<i64: 1, 8, 16>}, {pipeline_mode = #tpu.pipeline_mode<synchronous>, transform_indices = @transform_1, window_bounds = array<i64: 32, 24>}, {pipeline_mode = #tpu.pipeline_mode<synchronous>, transform_indices = @transform_2, window_bounds = array<i64: 32, 1>}, {pipeline_mode = #tpu.pipeline_mode<synchronous>, transform_indices = @transform_3, window_bounds = array<i64: 8, 96>}, {pipeline_mode = #tpu.pipeline_mode<synchronous>, transform_indices = @transform_4, window_bounds = array<i64: 8, 1>}, {transform_indices = @transform_5, window_bounds = array<i64: 1, 8, 16>}]} {
    %c0_i32 = arith.constant 0 : i32
    %0 = arith.cmpi eq, %arg1, %c0_i32 : i32
    %1 = arith.extui %0 : i1 to i32
    %c0_i32_0 = arith.constant 0 : i32
    %2 = arith.cmpi ne, %1, %c0_i32_0 : i32
    scf.if %2 {
      %c0_46 = arith.constant 0 : index
      %c0_47 = arith.constant 0 : index
      %c0_48 = arith.constant 0 : index
      %49 = vector.load %arg2[%c0_46, %c0_47, %c0_48] : memref<1x8x16xf32, #tpu.memory_space<vmem>>, vector<1x8x1xf32>
      %50 = vector.shape_cast %49 : vector<1x8x1xf32> to vector<8x1xf32>
      %51 = vector.shape_cast %50 : vector<8x1xf32> to vector<8x1xf32>
      %52 = vector.broadcast %51 : vector<8x1xf32> to vector<8x4xf32>
      %c0_49 = arith.constant 0 : index
      %c0_50 = arith.constant 0 : index
      %53 = vector.load %arg8[%c0_49, %c0_50] : memref<8x20xf32, #tpu.memory_space<vmem>>, vector<8x4xf32>
      tpu.vector_store %arg8[%c0_49, %c0_50], %52 {strides = array<i32>} : memref<8x20xf32, #tpu.memory_space<vmem>>, vector<8x4xf32>,
    } else {
    }
    %c0_i32_1 = arith.constant 0 : i32
    %3 = arith.cmpi sgt, %arg1, %c0_i32_1 : i32
    %4 = arith.extui %3 : i1 to i32
    %c0_i32_2 = arith.constant 0 : i32
    %5 = arith.cmpi ne, %4, %c0_i32_2 : i32
    scf.if %5 {
      %c0_46 = arith.constant 0 : index
      %c16_47 = arith.constant 16 : index
      %49 = vector.load %arg8[%c0_46, %c16_47] : memref<8x20xf32, #tpu.memory_space<vmem>>, vector<8x4xf32>
      %c0_48 = arith.constant 0 : index
      %c0_49 = arith.constant 0 : index
      %50 = vector.load %arg8[%c0_48, %c0_49] : memref<8x20xf32, #tpu.memory_space<vmem>>, vector<8x4xf32>
      tpu.vector_store %arg8[%c0_48, %c0_49], %49 {strides = array<i32>} : memref<8x20xf32, #tpu.memory_space<vmem>>, vector<8x4xf32>,
    } else {
    }
    %c0 = arith.constant 0 : index
    %c0_3 = arith.constant 0 : index
    %c0_4 = arith.constant 0 : index
    %6 = vector.load %arg2[%c0, %c0_3, %c0_4] : memref<1x8x16xf32, #tpu.memory_space<vmem>>, vector<1x8x16xf32>
    %7 = vector.shape_cast %6 : vector<1x8x16xf32> to vector<8x16xf32>
    %c0_5 = arith.constant 0 : index
    %c4 = arith.constant 4 : index
    %8 = vector.load %arg8[%c0_5, %c4] : memref<8x20xf32, #tpu.memory_space<vmem>>, vector<8x16xf32>
    tpu.vector_store %arg8[%c0_5, %c4], %7 {strides = array<i32>} : memref<8x20xf32, #tpu.memory_space<vmem>>, vector<8x16xf32>,
    %c0_6 = arith.constant 0 : index
    %c0_7 = arith.constant 0 : index
    %9 = vector.load %arg8[%c0_6, %c0_7] : memref<8x20xf32, #tpu.memory_space<vmem>>, vector<8x18xf32>
    %c0_8 = arith.constant 0 : index
    %c0_9 = arith.constant 0 : index
    %10 = vector.load %arg9[%c0_8, %c0_9] : memref<24x18xf32, #tpu.memory_space<vmem>>, vector<8x18xf32>
    tpu.vector_store %arg9[%c0_8, %c0_9], %9 {strides = array<i32>} : memref<24x18xf32, #tpu.memory_space<vmem>>, vector<8x18xf32>,
    %c0_10 = arith.constant 0 : index
    %c1 = arith.constant 1 : index
    %11 = vector.load %arg8[%c0_10, %c1] : memref<8x20xf32, #tpu.memory_space<vmem>>, vector<8x18xf32>
    %c8 = arith.constant 8 : index
    %c0_11 = arith.constant 0 : index
    %12 = vector.load %arg9[%c8, %c0_11] : memref<24x18xf32, #tpu.memory_space<vmem>>, vector<8x18xf32>
    tpu.vector_store %arg9[%c8, %c0_11], %11 {strides = array<i32>} : memref<24x18xf32, #tpu.memory_space<vmem>>, vector<8x18xf32>,
    %c0_12 = arith.constant 0 : index
    %c2 = arith.constant 2 : index
    %13 = vector.load %arg8[%c0_12, %c2] : memref<8x20xf32, #tpu.memory_space<vmem>>, vector<8x18xf32>
    %c16 = arith.constant 16 : index
    %c0_13 = arith.constant 0 : index
    %14 = vector.load %arg9[%c16, %c0_13] : memref<24x18xf32, #tpu.memory_space<vmem>>, vector<8x18xf32>
    tpu.vector_store %arg9[%c16, %c0_13], %13 {strides = array<i32>} : memref<24x18xf32, #tpu.memory_space<vmem>>, vector<8x18xf32>,
    %c0_14 = arith.constant 0 : index
    %c0_15 = arith.constant 0 : index
    %15 = vector.load %arg3[%c0_14, %c0_15] : memref<32x24xbf16, #tpu.memory_space<vmem>>, vector<32x24xbf16>
    %c0_16 = arith.constant 0 : index
    %c0_17 = arith.constant 0 : index
    %16 = vector.load %arg9[%c0_16, %c0_17] : memref<24x18xf32, #tpu.memory_space<vmem>>, vector<24x18xf32>
    %17 = arith.truncf %16 : vector<24x18xf32> to vector<24x18xbf16>
    %cst = arith.constant dense<0.000000e+00> : vector<32x18xf32>
    %18 = tpu.matmul %15, %17, %cst {dimension_numbers = #tpu.dot_dimension_numbers<[1], [0], [0], [1], [0, 0, 1, 1], [], []>} : vector<32x24xbf16>, vector<24x18xbf16>, vector<32x18xf32> -> vector<32x18xf32>
    %c0_18 = arith.constant 0 : index
    %c0_19 = arith.constant 0 : index
    %19 = vector.load %arg4[%c0_18, %c0_19] : memref<32x1xf32, #tpu.memory_space<vmem>>, vector<32x1xf32>
    %20 = vector.broadcast %19 : vector<32x1xf32> to vector<32x18xf32>
    %21 = arith.addf %18, %20 : vector<32x18xf32>
    %cst_20 = arith.constant 0.000000e+00 : f32
    %22 = vector.broadcast %cst_20 : f32 to vector<32x18xf32>
    %23 = arith.cmpf ogt, %21, %22 : vector<32x18xf32>
    %cst_21 = arith.constant 0.00999999977 : f32
    %24 = vector.broadcast %cst_21 : f32 to vector<32x18xf32>
    %25 = arith.mulf %24, %21 : vector<32x18xf32>
    %26 = arith.select %23, %21, %25 : vector<32x18xi1>, vector<32x18xf32>
    %c0_22 = arith.constant 0 : index
    %c0_23 = arith.constant 0 : index
    %27 = vector.load %arg10[%c0_22, %c0_23] : memref<32x18xf32, #tpu.memory_space<vmem>>, vector<32x18xf32>
    tpu.vector_store %arg10[%c0_22, %c0_23], %26 {strides = array<i32>} : memref<32x18xf32, #tpu.memory_space<vmem>>, vector<32x18xf32>,
    %c0_24 = arith.constant 0 : index
    %c0_25 = arith.constant 0 : index
    %28 = vector.load %arg10[%c0_24, %c0_25] : memref<32x18xf32, #tpu.memory_space<vmem>>, vector<32x16xf32>
    %c0_26 = arith.constant 0 : index
    %c0_27 = arith.constant 0 : index
    %29 = vector.load %arg11[%c0_26, %c0_27] : memref<96x16xf32, #tpu.memory_space<vmem>>, vector<32x16xf32>
    tpu.vector_store %arg11[%c0_26, %c0_27], %28 {strides = array<i32>} : memref<96x16xf32, #tpu.memory_space<vmem>>, vector<32x16xf32>,
    %c0_28 = arith.constant 0 : index
    %c1_29 = arith.constant 1 : index
    %30 = vector.load %arg10[%c0_28, %c1_29] : memref<32x18xf32, #tpu.memory_space<vmem>>, vector<32x16xf32>
    %c32 = arith.constant 32 : index
    %c0_30 = arith.constant 0 : index
    %31 = vector.load %arg11[%c32, %c0_30] : memref<96x16xf32, #tpu.memory_space<vmem>>, vector<32x16xf32>
    tpu.vector_store %arg11[%c32, %c0_30], %30 {strides = array<i32>} : memref<96x16xf32, #tpu.memory_space<vmem>>, vector<32x16xf32>,
    %c0_31 = arith.constant 0 : index
    %c2_32 = arith.constant 2 : index
    %32 = vector.load %arg10[%c0_31, %c2_32] : memref<32x18xf32, #tpu.memory_space<vmem>>, vector<32x16xf32>
    %c64 = arith.constant 64 : index
    %c0_33 = arith.constant 0 : index
    %33 = vector.load %arg11[%c64, %c0_33] : memref<96x16xf32, #tpu.memory_space<vmem>>, vector<32x16xf32>
    tpu.vector_store %arg11[%c64, %c0_33], %32 {strides = array<i32>} : memref<96x16xf32, #tpu.memory_space<vmem>>, vector<32x16xf32>,
    %c0_34 = arith.constant 0 : index
    %c0_35 = arith.constant 0 : index
    %34 = vector.load %arg5[%c0_34, %c0_35] : memref<8x96xbf16, #tpu.memory_space<vmem>>, vector<8x96xbf16>
    %c0_36 = arith.constant 0 : index
    %c0_37 = arith.constant 0 : index
    %35 = vector.load %arg11[%c0_36, %c0_37] : memref<96x16xf32, #tpu.memory_space<vmem>>, vector<96x16xf32>
    %36 = arith.truncf %35 : vector<96x16xf32> to vector<96x16xbf16>
    %cst_38 = arith.constant dense<0.000000e+00> : vector<8x16xf32>
    %37 = tpu.matmul %34, %36, %cst_38 {dimension_numbers = #tpu.dot_dimension_numbers<[1], [0], [0], [1], [0, 0, 1, 1], [], []>} : vector<8x96xbf16>, vector<96x16xbf16>, vector<8x16xf32> -> vector<8x16xf32>
    %c0_39 = arith.constant 0 : index
    %c0_40 = arith.constant 0 : index
    %38 = vector.load %arg6[%c0_39, %c0_40] : memref<8x1xf32, #tpu.memory_space<vmem>>, vector<8x1xf32>
    %39 = vector.broadcast %38 : vector<8x1xf32> to vector<8x16xf32>
    %40 = arith.addf %37, %39 : vector<8x16xf32>
    %cst_41 = arith.constant 0.000000e+00 : f32
    %41 = vector.broadcast %cst_41 : f32 to vector<8x16xf32>
    %42 = arith.cmpf ogt, %40, %41 : vector<8x16xf32>
    %cst_42 = arith.constant 0.00999999977 : f32
    %43 = vector.broadcast %cst_42 : f32 to vector<8x16xf32>
    %44 = arith.mulf %43, %40 : vector<8x16xf32>
    %45 = arith.select %42, %40, %44 : vector<8x16xi1>, vector<8x16xf32>
    %c0_43 = arith.constant 0 : index
    %c0_44 = arith.constant 0 : index
    %c0_45 = arith.constant 0 : index
    %46 = vector.load %arg7[%c0_43, %c0_44, %c0_45] : memref<1x8x16xf32, #tpu.memory_space<vmem>>, vector<1x8x16xf32>
    %47 = vector.shape_cast %46 : vector<1x8x16xf32> to vector<8x16xf32>
    %48 = vector.shape_cast %45 : vector<8x16xf32> to vector<1x8x16xf32>
    tpu.vector_store %arg7[%c0_43, %c0_44, %c0_45], %48 {strides = array<i32>} : memref<1x8x16xf32, #tpu.memory_space<vmem>>, vector<1x8x16xf32>,
    return
  }
  func.func @transform_0(%arg0: i32, %arg1: i32) -> (i32, i32, i32) {
    %c0_i32 = arith.constant 0 : i32
    %c0_i32_0 = arith.constant 0 : i32
    return %arg0, %c0_i32, %arg1 : i32, i32, i32
  }
  func.func @transform_1(%arg0: i32, %arg1: i32) -> (i32, i32) {
    %c0_i32 = arith.constant 0 : i32
    %c0_i32_0 = arith.constant 0 : i32
    %c0_i32_1 = arith.constant 0 : i32
    return %c0_i32, %c0_i32_0 : i32, i32
  }
  func.func @transform_2(%arg0: i32, %arg1: i32) -> (i32, i32) {
    %c0_i32 = arith.constant 0 : i32
    %c0_i32_0 = arith.constant 0 : i32
    %c0_i32_1 = arith.constant 0 : i32
    return %c0_i32, %c0_i32_0 : i32, i32
  }
  func.func @transform_3(%arg0: i32, %arg1: i32) -> (i32, i32) {
    %c0_i32 = arith.constant 0 : i32
    %c0_i32_0 = arith.constant 0 : i32
    %c0_i32_1 = arith.constant 0 : i32
    return %c0_i32, %c0_i32_0 : i32, i32
  }
  func.func @transform_4(%arg0: i32, %arg1: i32) -> (i32, i32) {
    %c0_i32 = arith.constant 0 : i32
    %c0_i32_0 = arith.constant 0 : i32
    %c0_i32_1 = arith.constant 0 : i32
    return %c0_i32, %c0_i32_0 : i32, i32
  }
  func.func @transform_5(%arg0: i32, %arg1: i32) -> (i32, i32, i32) {
    %c0_i32 = arith.constant 0 : i32
    %c0_i32_0 = arith.constant 0 : i32
    return %arg0, %c0_i32, %arg1 : i32, i32, i32
  }
}

</mosaic_0001>

<bundles_post_ra>
// kernel: tpu_custom_call.1
= control target key start
LH: loop header
LB: loop body
LE: loop exit
PB: predicated region body
PF: predicated region fallthrough
CT: control target
= control target key end

     0   :  { %10 = vsyncpa [#allocation7], 0  ;;  %s924_s0 = inlined_call_operand.vmem [shape: f32[2,8,16], index: 0, kind: input, shape index: {}]   ;;  %s925_s1 = inlined_call_operand.vmem [shape: bf16[32,24], index: 1, kind: input, shape index: {}]   ;;  %s926_s2 = inlined_call_operand.vmem [shape: f32[32,1], index: 2, kind: input, shape index: {}]   ;;  %s927_s3 = inlined_call_operand.vmem [shape: bf16[8,96], index: 3, kind: input, shape index: {}]   ;;  %s928_s4 = inlined_call_operand.vmem [shape: f32[8,1], index: 4, kind: input, shape index: {}]   ;;  %s929_s5 = inlined_call_operand.hbm [shape: f32[2,8,16], index: 5, kind: output, shape index: {}]  }
   0x1   :  { %12 = vsyncpa [#allocation7 + $0x1], 0  ;;  %s773_s18 = smov 0   ;;  %s775_s19 = smov 0  }
   0x2   :  { %s777_s20 = smov 0   ;;  %s779_s21 = smov 0  }
   0x3   :  { %s781_s22 = smov 0   ;;  %s783_s23 = smov 0  }
   0x4 LB: > { %s571_s24 = sadd.s32 4294967295, %s737_s23   ;;  %s572_s25 = sadd.s32 4294967294, %s737_s23   ;;  %s737_s23 = sphi %s783_s23, %s18_s23   ;;  %s733_s22 = sphi %s781_s22, %s936_s22   ;;  %s729_s21 = sphi %s779_s21, %s935_s21   ;;  %s725_s20 = sphi %s777_s20, %s934_s20   ;;  %s721_s19 = sphi %s775_s19, %s933_s19   ;;  %s717_s18 = sphi %s773_s18, %s932_s18  }
   0x5   : > { %s30_s26 = sadd.s32 1, %s733_s22  ;;  %s151_s27 = sadd.s32 1, %s725_s20 }
   0x6   : > { %p32_p0 = scmp.ge.s32.totalorder %s30_s26, 2  ;;  %p161_p1 = scmp.ne.s32.totalorder %s725_s20, %s721_s19 }
   0x7   : > { %p162_p2 = scmp.eq.s32.totalorder %s571_s24, 1  ;;  %p167_p3 = scmp.ne.s32.totalorder %s721_s19, %s717_s18 }
   0x8   : > { %s938_s26 = smov (%p32_p0, %s30_s26), 0  ;;  %p168_p5 = scmp.eq.s32.totalorder %s572_s25, 1 }
   0x9   : > { %p813_p4 = por %p162_p2, %p161_p1  ;;  %s146_s29 = ssub.s32 %s733_s22, %s938_s26 }
   0xa   : > { %p575_p6 = scmp.ge.s32.totalorder %s737_s23, 1  ;;  %p149_p7 = scmp.eq.s32.totalorder %s146_s29, 0 }
   0xb   : > { %p820_p8 = por %p168_p5, %p167_p3  ;;  %p208_p9 = scmp.lt.s32.totalorder %s737_s23, 3 }
   0xc   : > { %s826_s6 = scalar_select %p149_p7, %s725_s20, %s151_s27  }
   0xd   : > { %p209_p10 = pnand %p575_p6, %p208_p9 }
   0xe   : > { %p238_p11 = scmp.lt.s32.totalorder (!%p209_p10), %s729_s21, 1  ;;  %s740_s12 = smov (!%p209_p10), 4  }
   0xf   : > { %212 = sbr.rel (%p209_p10) target bundleno = 731 (0x2db), region = 40  ;;  %s741_s15 = smov (!%p209_p10), 126  }
  0x10   : > { %s742_s16 = smov (!%p209_p10), 127   ;;  %s590_s24 = sshll.u32 (!%p209_p10), %s729_s21, 3 }
  0x11   : > { %s495_s29 = scalar_lea.hbm (!%p209_p10), %s929_s5, %s590_s24  ;;  %s679_s14 = scalar_lea.hbm (!%p209_p10), %s929_s5, 16 }
  0x12   : > { %s499_s9 = sshll.u32 (!%p209_p10), %s495_s29, 4  ;;  %s500_s9 = int_to_ptr.hbm [resolvable:$true] %s499_s9 }
  0x14   : > { %v739_v0 = vmov 0   ;;  %s239_s7 = scalar_select %p238_p11, %s729_s21, 1  ;;  %v300_v2 = vld [vmem:[%s926_s2] sm:$0xff]  ;;  %vm256_vm0 = vcmask 31744   ;;  %vm274_vm1 = vcmask 162848   ;;  %vm277_vm2 = vcmask 146432  }
  0x15   : > { %656 = vset.pattern.permute.xlu0 %v739_v0  ;;  %658 = vset.pattern.permute.xlu1 %v739_v0  ;;  %v301_v6 = vld [vmem:[%s926_s2 + $0x8] sm:$0xff]  ;;  %v302_v7 = vld [vmem:[%s926_s2 + $0x10] sm:$0xff]  ;;  %v303_v8 = vld [vmem:[%s926_s2 + $0x18] sm:$0xff]  ;;  %vm341_vm3 = vcmask 1043456   ;;  %vm334_vm4 = vcmask 195584   ;;  %vm384_vm8 = vcmask 130048  }
  0x16   : > { %657 = vset.pattern.permute.xlu2 %v739_v0  ;;  %s577_s8 = sshll.u32 %s239_s7, 3  ;;  %v593_v17 = vld [vmem:[%s925_s1] sm:$0xff]  ;;  %v594_v18 = vld [vmem:[%s925_s1 + $0x8] sm:$0xff]  ;;  %vm462_vm10 = vcmask 785408   ;;  %s673_s21 = sshra.s32 %s500_s9, 4  ;;  %s674_s21 = int_to_ptr.hbm [resolvable:$true] %s673_s21 }
  0x17   : > { %s244_s11 = scalar_lea.vmem %s924_s0, %s577_s8  ;;  %316 = vperm.xlu2 %657, %v302_v7   ;;  %v456_v43 = vld [vmem:[%s928_s4] sm:$0xff]  ;;  %p680_p1 = scmp.lt.s32.totalorder %s674_s21, %s929_s5 }
  0x18   : > { %v250_v1 = vld [vmem:[%s244_s11] sm:$0xff]  ;;  %s675_s11 = scalar_lea.hbm %s674_s21, 8 }
  0x19   : > { %253 = vperm.xlu0 %656, %v250_v1   ;;  %p676_p12 = scmp.ne.s32.totalorder %s674_s21, %s675_s11  ;;  %p681_p2 = scmp.lt.s32.totalorder %s679_s14, %s675_s11 }
  0x1b   : > { %p677_p13 = pnand %p676_p12, %p813_p4  ;;  %p682_p3 = por %p681_p2, %p680_p1 }
  0x1d   : > { %p678_p0 = pneg %p677_p13 }
  0x1f   : > { %321 = vperm.xlu2 %657, %v303_v8   ;;  %p683_p5 = pnand %p682_p3, %p678_p0 }
  0x21   : > { %271 = vrot.lane.b32.xlu0 %v250_v1, %s740_s12 }
  0x29   : > { %306 = vperm.xlu0 %656, %v300_v2  }
  0x71   : > { %v317_v23 = vpop.permute.xlu2 %316 }
  0x79   : > { %v322_v35 = vpop.permute.xlu2 %321 }
  0x8b   : > { %v254_v3 = vpop.permute.xlu0 %253 }
  0x8c   : > { %257 = vst.msk [vmem:[#allocation2] sm:$0xff] %vm256_vm0, %v254_v3 }
  0x93   : > { %v272_v4 = vpop.permute.xlu0 %271 }
  0x94   : > { %275 = vst.msk [vmem:[#allocation2] sm:$0xff] %vm274_vm1, %v272_v4 }
  0x9b   : > { %v285_v5 = vld [vmem:[#allocation2] sm:$0xff]  ;;  %v307_v19 = vpop.permute.xlu0 %306 }
  0x9c   : > { %287 = vrot.lane.b32.xlu1 %v285_v5, %s741_s15  ;;  %278 = vst.msk [vmem:[#allocation3] sm:$0xff] %vm277_vm2, %v285_v5 }
  0xa3   : > { %v295_v14 = vld [vmem:[#allocation3] sm:$0xff] }
  0xa4   : > { %281 = vrot.lane.b32.xlu1 %v285_v5, %s742_s16 }
  0xac   : > { %311 = vperm.xlu1 %658, %v301_v6   ;;  %v437_v6 = vld [vmem:[%s927_s3] sm:$0xf] }
 0x10e   : > { %v288_v9 = vpop.permute.xlu1 %287 }
 0x10f   : > { %290 = vst.msk [vmem:[#allocation3 + $0x10] sm:$0xff] %vm277_vm2, %v288_v9 }
 0x116   : > { %v282_v10 = vpop.permute.xlu1 %281  ;;  %v297_v11 = vld [vmem:[#allocation3 + $0x10] sm:$0xff] }
 0x117   : > { %284 = vst.msk [vmem:[#allocation3 + $0x8] sm:$0xff] %vm277_vm2, %v282_v10  ;;  %v299_v12 = vpack.c.bf16 %v297_v11, %v297_v11 }
 0x119   : > { %v343_v13 = vsel %vm341_vm3, %v299_v12, 0 }
 0x11a   : > { %351 = vmatpush.bf16.msra.mxu0 %v343_v13  ;;  %595 = vmatpush.bf16.msra.mxu2 %v343_v13 }
 0x11e   : > { %v296_v15 = vld [vmem:[#allocation3 + $0x8] sm:$0xff]  ;;  %v312_v26 = vpop.permute.xlu1 %311 }
 0x11f   : > { %v298_v16 = vpack.c.bf16 %v296_v15, %v295_v14 }
 0x121   : > { %352 = vmatpush.bf16.msra.mxu0 %v298_v16  ;;  %596 = vmatpush.bf16.msra.mxu2 %v298_v16 }
 0x124   : > { %586 = vmatmul.msk.bf16.vlgmr.msra.gmra.mxu0 %vm334_vm4, %v593_v17  ;;  %587 = vmatmul.msk.bf16.vlgmr.msra.gmra.mxu2 %vm334_vm4, %v594_v18 }
 0x1a1   : > { %v354_v20 = vpop.f32.mrf.mxu0 }
 0x1a2   : > { %v355_v21 = vadd.f32 %v354_v20, %v307_v19 }
 0x1a4   : > { %vm364_vm5 = vcmp.gt.f32.partialorder %v355_v21, 0.0  ;;  %v368_v22 = vmul.f32 0.01, %v355_v21 }
 0x1a6   : > { %v372_v24 = vsel %vm364_vm5, %v355_v21, %v368_v22 }
 0x1a7   : > { %376 = vst.msk [vmem:[#allocation4] sm:$0xff] %vm277_vm2, %v372_v24  ;;  %v359_v25 = vpop.f32.mrf.mxu2 }
 0x1a8   : > { %v360_v27 = vadd.f32 %v359_v25, %v317_v23 }
 0x1a9   : > { %v356_v28 = vpop.f32.mrf.mxu0 }
 0x1aa   : > { %vm366_vm6 = vcmp.gt.f32.partialorder %v360_v27, 0.0  ;;  %v370_v29 = vmul.f32 0.01, %v360_v27  ;;  %v357_v30 = vadd.f32 %v356_v28, %v312_v26 }
 0x1ac   : > { %v374_v31 = vsel %vm366_vm6, %v360_v27, %v370_v29  ;;  %vm365_vm7 = vcmp.gt.f32.partialorder %v357_v30, 0.0  ;;  %v369_v32 = vmul.f32 0.01, %v357_v30 }
 0x1ad   : > { %378 = vst.msk [vmem:[#allocation4 + $0x10] sm:$0xff] %vm277_vm2, %v374_v31 }
 0x1ae   : > { %v373_v33 = vsel %vm365_vm7, %v357_v30, %v369_v32  ;;  %v413_v34 = vld [vmem:[#allocation4] sm:$0xff] }
 0x1af   : > { %377 = vst.msk [vmem:[#allocation4 + $0x8] sm:$0xff] %vm277_vm2, %v373_v33  ;;  %v361_v36 = vpop.f32.mrf.mxu2  ;;  %421 = vrot.lane.b32.xlu1 %v413_v34, %s741_s15 }
 0x1b0   : > { %v362_v37 = vadd.f32 %v361_v36, %v322_v35  ;;  %385 = vst.msk [vmem:[#allocation5] sm:$0xff] %vm384_vm8, %v413_v34 }
 0x1b2   : > { %vm367_vm9 = vcmp.gt.f32.partialorder %v362_v37, 0.0  ;;  %v371_v38 = vmul.f32 0.01, %v362_v37 }
 0x1b4   : > { %v375_v39 = vsel %vm367_vm9, %v362_v37, %v371_v38  ;;  %v415_v40 = vld [vmem:[#allocation4 + $0x10] sm:$0xff] }
 0x1b5   : > { %379 = vst.msk [vmem:[#allocation4 + $0x18] sm:$0xff] %vm277_vm2, %v375_v39  ;;  %425 = vrot.lane.b32.xlu2 %v415_v40, %s741_s15 }
 0x1b6   : > { %v414_v41 = vld [vmem:[#allocation4 + $0x8] sm:$0xff]  ;;  %387 = vst.msk [vmem:[#allocation5 + $0x10] sm:$0xff] %vm384_vm8, %v415_v40 }
 0x1b7   : > { %386 = vst.msk [vmem:[#allocation5 + $0x8] sm:$0xff] %vm384_vm8, %v414_v41  ;;  %v438_v4 = vld [vmem:[#allocation5] sm:$0xff] }
 0x1bc   : > { %v416_v42 = vld [vmem:[#allocation4 + $0x18] sm:$0xff] }
 0x1bd   : > { %427 = vrot.lane.b32.xlu0 %v416_v42, %s741_s15  ;;  %423 = vrot.lane.b32.xlu2 %v414_v41, %s741_s15  ;;  %388 = vst.msk [vmem:[#allocation5 + $0x18] sm:$0xff] %vm384_vm8, %v416_v42  ;;  %v440_v1 = vld [vmem:[#allocation5 + $0x10] sm:$0xff] }
 0x1be   : > { %403 = vrot.lane.b32.xlu1 %v416_v42, %s742_s16  ;;  %v439_v3 = vld [vmem:[#allocation5 + $0x8] sm:$0xff] }
 0x1bf   : > { %v450_v5 = vpack.c.bf16 %v439_v3, %v438_v4 }
 0x1c4   : > { %v441_v0 = vld [vmem:[#allocation5 + $0x18] sm:$0xff] }
 0x1c5   : > { %401 = vrot.lane.b32.xlu0 %v415_v40, %s742_s16  ;;  %397 = vrot.lane.b32.xlu2 %v413_v34, %s742_s16  ;;  %v451_v2 = vpack.c.bf16 %v441_v0, %v440_v1 }
 0x1c6   : > { %459 = vperm.xlu1 %658, %v456_v43  }
 0x1cd   : > { %399 = vrot.lane.b32.xlu0 %v414_v41, %s742_s16  ;;  %s235_s16 = sand.u32 1, %s721_s19  }
 0x1ce   : > { %s576_s17 = sshll.u32 %s235_s16, 3  ;;  %s484_s10 = scalar_lea.sflag [#allocation7], %s235_s16 }
 0x1cf   : > { %s237_s7 = scalar_lea.vmem [#allocation6], %s576_s17 }
 0x1d0   : > { %s497_s8 = sshll.u32 %s237_s7, 4  ;;  %s498_s8 = int_to_ptr.vmem [resolvable:$true] %s497_s8 }
 0x20f   : > { %v426_v44 = vpop.permute.xlu2 %425 }
 0x210   : > { %435 = vst.msk [vmem:[#allocation5 + $0x50] sm:$0xff] %vm384_vm8, %v426_v44 }
 0x217   : > { %v424_v45 = vpop.permute.xlu2 %423  ;;  %v448_v51 = vld [vmem:[#allocation5 + $0x50] sm:$0xff] }
 0x218   : > { %434 = vst.msk [vmem:[#allocation5 + $0x48] sm:$0xff] %vm384_vm8, %v424_v45 }
 0x21f   : > { %v398_v46 = vpop.permute.xlu2 %397  ;;  %v447_v55 = vld [vmem:[#allocation5 + $0x48] sm:$0xff] }
 0x220   : > { %409 = vst.msk [vmem:[#allocation5 + $0x20] sm:$0xff] %vm384_vm8, %v398_v46 }
 0x221   : > { %v422_v47 = vpop.permute.xlu1 %421 }
 0x222   : > { %433 = vst.msk [vmem:[#allocation5 + $0x40] sm:$0xff] %vm384_vm8, %v422_v47 }
 0x227   : > { %v442_v61 = vld [vmem:[#allocation5 + $0x20] sm:$0xff] }
 0x229   : > { %v446_v54 = vld [vmem:[#allocation5 + $0x40] sm:$0xff] }
 0x22a   : > { %v454_v56 = vpack.c.bf16 %v447_v55, %v446_v54 }
 0x22f   : > { %v428_v48 = vpop.permute.xlu0 %427 }
 0x230   : > { %v404_v49 = vpop.permute.xlu1 %403  ;;  %436 = vst.msk [vmem:[#allocation5 + $0x58] sm:$0xff] %vm384_vm8, %v428_v48 }
 0x231   : > { %412 = vst.msk [vmem:[#allocation5 + $0x38] sm:$0xff] %vm384_vm8, %v404_v49 }
 0x237   : > { %v402_v50 = vpop.permute.xlu0 %401  ;;  %v449_v52 = vld [vmem:[#allocation5 + $0x58] sm:$0xff] }
 0x238   : > { %411 = vst.msk [vmem:[#allocation5 + $0x30] sm:$0xff] %vm384_vm8, %v402_v50  ;;  %v455_v53 = vpack.c.bf16 %v449_v52, %v448_v51  ;;  %v445_v59 = vld [vmem:[#allocation5 + $0x38] sm:$0xff]  ;;  %v460_v7 = vpop.permute.xlu1 %459 }
 0x23a   : > { %468 = vmatpush.bf16.msra.mxu1 %v455_v53 }
 0x23e   : > { %469 = vmatpush.bf16.msra.mxu1 %v454_v56 }
 0x23f   : > { %v400_v57 = vpop.permute.xlu0 %399  ;;  %v444_v58 = vld [vmem:[#allocation5 + $0x30] sm:$0xff] }
 0x240   : > { %410 = vst.msk [vmem:[#allocation5 + $0x28] sm:$0xff] %vm384_vm8, %v400_v57  ;;  %v453_v60 = vpack.c.bf16 %v445_v59, %v444_v58 }
 0x242   : > { %470 = vmatpush.bf16.msra.mxu1 %v453_v60 }
 0x247   : > { %v443_v62 = vld [vmem:[#allocation5 + $0x28] sm:$0xff] }
 0x248   : > { %v452_v63 = vpack.c.bf16 %v443_v62, %v442_v61 }
 0x24a   : > { %471 = vmatpush.bf16.msra.mxu1 %v452_v63 }
 0x24e   : > { %472 = vmatpush.bf16.msra.mxu1 %v451_v2 }
 0x252   : > { %473 = vmatpush.bf16.msra.mxu1 %v450_v5 }
 0x255   : > { %588 = vmatmul.msk.bf16.vlgmr.msra.gmra.mxu1 %vm462_vm10, %v437_v6 }
 0x2d2   : > { %v475_v8 = vpop.f32.mrf.mxu1 }
 0x2d3   : > { %v476_v9 = vadd.f32 %v475_v8, %v460_v7 }
 0x2d5   : > { %vm479_vm11 = vcmp.gt.f32.partialorder %v476_v9, 0.0  ;;  %v480_v10 = vmul.f32 0.01, %v476_v9 }
 0x2d7   : > { %v481_v11 = vsel %vm479_vm11, %v476_v9, %v480_v10 }
 0x2d8   : > { %482 = vst.msk [vmem:[%s237_s7] sm:$0xff] %vm384_vm8, %v481_v11 }
 0x2d9   : > { %686 = shalt.err (!%p683_p5)
}
 0x2da   : > { %597 = dma.vmem_to_hbm [thread:$0]  (%p813_p4), %s498_s8, 128, %s500_s9, %s484_s10   ;;  %v477_v12 = vpop.f32.mrf.mxu1 }
 0x2db PF: > { %p603_p6 = scmp.ge.s32.totalorder %s737_s23, 2  ;;  %s511_s16 = sand.u32 1, %s717_s18  }
 0x2dc   : > { %s512_s24 = scalar_lea.sflag [#allocation7], %s511_s16 }
 0x2dd   : > { %p600_p7 = pnand %p603_p6, %p820_p8 }
 0x2df   : > { %p601_p9 = pneg %p600_p7 }
 0x2e1   : > { %712 = dma.done.wait (%p601_p9), %s512_s24, 128  }
 0x2e2   : > { %714 = vsyncadd (%p601_p9), %s512_s24, 4294967168  ;;  %s18_s23 = sadd.s32 1, %s737_s23   ;;  %s932_s18 = smov %s721_s19 }
 0x2e3   : > { %p15_p10 = scmp.ge.s32.totalorder %s18_s23, 4   ;;  %s933_s19 = smov %s725_s20 }
 0x2e4   : > { %s934_s20 = smov %s826_s6  ;;  %s935_s21 = smov %s733_s22 }
 0x2e5   : > { %s936_s22 = smov %s938_s26  ;;  %17 = sbr.rel (!%p15_p10) target bundleno = 4 (0x4), region = 83 }
 0x2ea   :  { %518 = vsyncpa [#allocation7], 1 }
 0x2eb   :  { %520 = vsyncpa [#allocation7 + $0x1], 1 }

</bundles_post_ra>
